<compile_context>
chip_gen: v7x
topology: tpu7x:2x2x1
jax: 0.10.0
libtpu: 0.0.40
codegen_flags: <defaults>
</compile_context>

<pallas_src>
import jax
import jax.numpy as jnp
from jax.experimental import pallas as pl
from jax.experimental.pallas import tpu as pltpu


def _round_up(x, m):
    return ((x + m - 1) // m) * m


def _trend_basis_kernel(theta_ref, basis_ref, back_ref, fore_ref):
    """One fused MXU matmul; two lane-aligned stores (backcast, forecast)."""
    Tb = back_ref.shape[1]
    Tf = fore_ref.shape[1]
    Tb_pad = basis_ref.shape[1] - Tf            # static, multiple of 128
    res = jnp.dot(theta_ref[...], basis_ref[...],
                  preferred_element_type=jnp.float32,
                  precision=jax.lax.Precision.HIGHEST)
    back_ref[...] = res[:, :Tb]                  # lane offset 0
    fore_ref[...] = res[:, Tb_pad:Tb_pad + Tf]   # lane offset multiple of 128


def make_trend_basis_params(degree_of_polynomial, backcast_size, forecast_size):
    """Deterministic parameter construction mirroring the PyTorch __init__."""
    polynomial_size = degree_of_polynomial + 1
    t_back = jnp.arange(backcast_size, dtype=jnp.float32) / backcast_size
    t_fore = jnp.arange(forecast_size, dtype=jnp.float32) / forecast_size
    powers = jnp.arange(polynomial_size, dtype=jnp.float32)[:, None]   # (P, 1)
    backcast_basis = jnp.power(t_back[None, :], powers)                # (P, Tb)
    forecast_basis = jnp.power(t_fore[None, :], powers)                # (P, Tf)
    return backcast_basis.astype(jnp.float32), forecast_basis.astype(jnp.float32)


def make_combined_basis(backcast_basis, forecast_basis):
    """Build the (2P, Tb_pad + Tf) combined basis ONCE (module constant).

    Rows P..2P-1, cols [0, Tb)            = backcast_basis
    Rows 0..P-1,  cols [Tb_pad, Tb_pad+Tf) = forecast_basis
    All other entries are exactly zero (kills the cross terms).
    """
    P, Tb = backcast_basis.shape
    Pf, Tf = forecast_basis.shape
    assert Pf == P
    Tb_pad = _round_up(Tb, 128)
    combined = jnp.zeros((2 * P, Tb_pad + Tf), dtype=jnp.float32)
    combined = combined.at[P:, :Tb].set(backcast_basis.astype(jnp.float32))
    combined = combined.at[:P, Tb_pad:Tb_pad + Tf].set(forecast_basis.astype(jnp.float32))
    return combined


def trend_basis_forward(theta, combined_basis, backcast_size, forecast_size,
                        *, batch_tile=2048):
    """theta: (B, 2P) f32; combined_basis: (2P, round_up(Tb,128)+Tf) f32.

    Returns (backcast (B, Tb), forecast (B, Tf)) — same as the PyTorch module.
    """
    B, two_p = theta.shape
    Tb, Tf = backcast_size, forecast_size
    Tb_pad = _round_up(Tb, 128)
    W = combined_basis.shape[1]
    assert combined_basis.shape[0] == two_p
    assert W == Tb_pad + Tf

    # ---- batch tiling (no theta padding; ragged last block) ----
    if B <= 8:
        TB = B                                           # single full block
    else:
        # >= 2 tiles when possible (v7x megacore), TB a multiple of 8.
        TB = min(_round_up(batch_tile, 8), _round_up(pl.cdiv(B, 2), 8))
    grid = (pl.cdiv(B, TB),)

    out_shapes = (jax.ShapeDtypeStruct((B, Tb), jnp.float32),
                  jax.ShapeDtypeStruct((B, Tf), jnp.float32))

    backcast, forecast = pl.pallas_call(
        _trend_basis_kernel,
        out_shape=out_shapes,
        grid=grid,
        in_specs=[
            pl.BlockSpec((TB, two_p), lambda i: (i, 0)),   # theta tile (streams)
            # Constant index_map -> basis is DMA'd once and stays resident.
            pl.BlockSpec((two_p, W), lambda i: (0, 0)),
        ],
        out_specs=(
            pl.BlockSpec((TB, Tb), lambda i: (i, 0)),
            pl.BlockSpec((TB, Tf), lambda i: (i, 0)),
        ),
        compiler_params=pltpu.CompilerParams(
            dimension_semantics=("parallel",)),
    )(theta, combined_basis)

    return backcast, forecast


if __name__ == "__main__":
    # Small shapes consistent with the module.
    degree_of_polynomial = 3          # -> P = 4
    backcast_size = 16
    forecast_size = 8
    batch = 2
    P = degree_of_polynomial + 1

    backcast_basis, forecast_basis = make_trend_basis_params(
        degree_of_polynomial, backcast_size, forecast_size)
    # Built once — a constant of the module, not rebuilt per forward call.
    combined = make_combined_basis(backcast_basis, forecast_basis)

    key = jax.random.PRNGKey(0)
    theta = jax.random.normal(key, (batch, 2 * P), dtype=jnp.float32)

    backcast, forecast = trend_basis_forward(
        theta, combined, backcast_size, forecast_size)
    backcast = jax.block_until_ready(backcast)
    forecast = jax.block_until_ready(forecast)

    # Reference check in plain JAX (same semantics as the torch.einsum calls),
    # with matching precision so the comparison is apples-to-apples.
    hp = jax.lax.Precision.HIGHEST
    back_ref = jnp.einsum('bp,pt->bt', theta[:, P:], backcast_basis, precision=hp)
    fore_ref = jnp.einsum('bp,pt->bt', theta[:, :P], forecast_basis, precision=hp)

    assert backcast.shape == (batch, backcast_size)
    assert forecast.shape == (batch, forecast_size)
    assert jnp.allclose(backcast, back_ref, atol=1e-5, rtol=1e-5)
    assert jnp.allclose(forecast, fore_ref, atol=1e-5, rtol=1e-5)

    print("KERNEL_OK")
</pallas_src>

<mosaic_0001>
module attributes {stable_mosaic.version = 11 : i64} {
  func.func @_trend_basis_kernel(%arg0: i32, %arg1: memref<2x8xf32, #tpu.memory_space<vmem>>, %arg2: memref<8x136xf32, #tpu.memory_space<vmem>>, %arg3: memref<2x16xf32, #tpu.memory_space<vmem>>, %arg4: memref<2x8xf32, #tpu.memory_space<vmem>>) attributes {dimension_semantics = [#tpu.dimension_semantics<parallel>], iteration_bounds = array<i64: 1>, scalar_prefetch = 0 : i64, scratch_operands = 0 : i64, tpu.core_type = #tpu.core_type<tc>, window_params = [{transform_indices = @transform_0, window_bounds = array<i64: 2, 8>}, {pipeline_mode = #tpu.pipeline_mode<synchronous>, transform_indices = @transform_1, window_bounds = array<i64: 8, 136>}, {transform_indices = @transform_2, window_bounds = array<i64: 2, 16>}, {transform_indices = @transform_3, window_bounds = array<i64: 2, 8>}]} {
    %c0 = arith.constant 0 : index
    %c0_0 = arith.constant 0 : index
    %0 = vector.load %arg1[%c0, %c0_0] : memref<2x8xf32, #tpu.memory_space<vmem>>, vector<2x8xf32>
    %c0_1 = arith.constant 0 : index
    %c0_2 = arith.constant 0 : index
    %1 = vector.load %arg2[%c0_1, %c0_2] : memref<8x136xf32, #tpu.memory_space<vmem>>, vector<8x136xf32>
    %cst = arith.constant dense<0.000000e+00> : vector<2x136xf32>
    %2 = tpu.matmul %0, %1, %cst {dimension_numbers = #tpu.dot_dimension_numbers<[1], [0], [0], [1], [0, 0, 1, 1], [], []>, precision = #tpu.contract_precision<fp32>} : vector<2x8xf32>, vector<8x136xf32>, vector<2x136xf32> -> vector<2x136xf32>
    %3 = vector.extract_strided_slice %2 {offsets = [0, 0], sizes = [2, 16], strides = [1, 1]} : vector<2x136xf32> to vector<2x16xf32>
    %c0_3 = arith.constant 0 : index
    %c0_4 = arith.constant 0 : index
    %4 = vector.load %arg3[%c0_3, %c0_4] : memref<2x16xf32, #tpu.memory_space<vmem>>, vector<2x16xf32>
    tpu.vector_store %arg3[%c0_3, %c0_4], %3 {strides = array<i32>} : memref<2x16xf32, #tpu.memory_space<vmem>>, vector<2x16xf32>,
    %5 = vector.extract_strided_slice %2 {offsets = [0, 128], sizes = [2, 8], strides = [1, 1]} : vector<2x136xf32> to vector<2x8xf32>
    %c0_5 = arith.constant 0 : index
    %c0_6 = arith.constant 0 : index
    %6 = vector.load %arg4[%c0_5, %c0_6] : memref<2x8xf32, #tpu.memory_space<vmem>>, vector<2x8xf32>
    tpu.vector_store %arg4[%c0_5, %c0_6], %5 {strides = array<i32>} : memref<2x8xf32, #tpu.memory_space<vmem>>, vector<2x8xf32>,
    return
  }
  func.func @transform_0(%arg0: i32) -> (i32, i32) {
    %c0_i32 = arith.constant 0 : i32
    %c0_i32_0 = arith.constant 0 : i32
    return %arg0, %c0_i32 : i32, i32
  }
  func.func @transform_1(%arg0: i32) -> (i32, i32) {
    %c0_i32 = arith.constant 0 : i32
    %c0_i32_0 = arith.constant 0 : i32
    %c0_i32_1 = arith.constant 0 : i32
    return %c0_i32, %c0_i32_0 : i32, i32
  }
  func.func @transform_2(%arg0: i32) -> (i32, i32) {
    %c0_i32 = arith.constant 0 : i32
    %c0_i32_0 = arith.constant 0 : i32
    return %arg0, %c0_i32 : i32, i32
  }
  func.func @transform_3(%arg0: i32) -> (i32, i32) {
    %c0_i32 = arith.constant 0 : i32
    %c0_i32_0 = arith.constant 0 : i32
    return %arg0, %c0_i32 : i32, i32
  }
}

</mosaic_0001>

<bundles_post_ra>
// kernel: tpu_custom_call.1
= control target key start
LH: loop header
LB: loop body
LE: loop exit
PB: predicated region body
PF: predicated region fallthrough
CT: control target
= control target key end

     0   :  { %9 = vsyncpa [#allocation3], 0  ;;  %s730_s0 = inlined_call_operand.hbm [shape: f32[2,8], index: 0, kind: input, shape index: {}]   ;;  %s731_s1 = inlined_call_operand.hbm [shape: f32[8,136], index: 1, kind: input, shape index: {}]   ;;  %s732_s2 = inlined_call_operand.hbm [shape: f32[2,16], index: 2, kind: output, shape index: {0}]   ;;  %s733_s3 = inlined_call_operand.hbm [shape: f32[2,8], index: 3, kind: output, shape index: {1}]  }
   0x1   :  { %10 = vsyncpa [#allocation6], 0 }
   0x2   :  { %11 = vsyncpa [#allocation4], 0 }
   0x3   :  { %12 = vsyncpa [#allocation9], 0  ;;  %s656_s12 = smov [#allocation2]   ;;  %s657_s14 = smov [#allocation5]  }
   0x4   :  { %s19_s13 = sshll.u32 %s656_s12, 4  ;;  %s29_s15 = sshll.u32 %s657_s14, 4  ;;  %s20_s13 = int_to_ptr.vmem [resolvable:$true] %s19_s13  ;;  %s30_s15 = int_to_ptr.vmem [resolvable:$true] %s29_s15 }
   0x5   :  { %s560_s18 = scalar_lea.hbm %s730_s0, 32 }
   0x6   :  { %p561_p0 = scmp.ne.s32.totalorder %s730_s0, %s560_s18  ;;  %p564_p1 = scmp.lt.u32.totalorder %s560_s18, %s730_s0 }
   0x8   :  { %p566_p2 = pnand %p564_p1, %p561_p0 }
   0xa   :  { %569 = shalt.err (!%p566_p2)
}
   0xb   :  { %s570_s23 = scalar_lea.vmem %s20_s13, 32  ;;  %p575_p4 = scmp.lt.s32.totalorder %s20_s13, %s20_s13 }
   0xc   :  { %p571_p3 = scmp.ne.s32.totalorder %s20_s13, %s570_s23  ;;  %p576_p5 = scmp.lt.s32.totalorder %s570_s23, %s570_s23 }
   0xe   :  { %p577_p6 = por %p576_p5, %p575_p4 }
  0x10   :  { %p578_p7 = pnand %p577_p6, %p571_p3 }
  0x12   :  { %581 = shalt.err (!%p578_p7)
}
  0x13   :  { %22 = dma.hbm_to_vmem [thread:$0]  %s730_s0, 32, %s20_s13, [#allocation3]  }
  0x14   :  { %s582_s28 = scalar_lea.hbm %s731_s1, 256 }
  0x15   :  { %p583_p8 = scmp.ne.s32.totalorder %s731_s1, %s582_s28  ;;  %p586_p9 = scmp.lt.u32.totalorder %s582_s28, %s731_s1 }
  0x17   :  { %p588_p10 = pnand %p586_p9, %p583_p8 }
  0x19   :  { %591 = shalt.err (!%p588_p10)
}
  0x1a   :  { %s592_s6 = scalar_lea.vmem %s30_s15, 256  ;;  %p597_p12 = scmp.lt.s32.totalorder %s30_s15, %s30_s15 }
  0x1b   :  { %p593_p11 = scmp.ne.s32.totalorder %s30_s15, %s592_s6  ;;  %p598_p13 = scmp.lt.s32.totalorder %s592_s6, %s592_s6 }
  0x1d   :  { %p599_p0 = por %p598_p13, %p597_p12 }
  0x1f   :  { %p600_p1 = pnand %p599_p0, %p593_p11 }
  0x21   :  { %603 = shalt.err (!%p600_p1)
}
  0x22   :  { %32 = dma.hbm_to_vmem [thread:$0]  %s731_s1, 256, %s30_s15, [#allocation6]  }
  0x23   :  { %648 = dma.done.wait [#allocation3], 32  }
  0x24   :  { %649 = vsyncadd [#allocation3], 4294967264 }
  0x25   :  { %650 = dma.done.wait [#allocation6], 256  }
  0x26   :  { %651 = vsyncadd [#allocation6], 4294967040  ;;  %v658_v0 = vmov 0.0   ;;  %vm42_vm0 = vcmask 64512   ;;  %v41_v1 = vld [vmem:[#allocation5 + $0x8] sm:$0xff]  ;;  %v40_v2 = vld [vmem:[#allocation5] sm:$0xff] }
  0x27   :  { %349 = vmatprep.mubr.f32.mxu0 %v658_v0  ;;  %112 = vmatprep.mubr.f32.mxu1 %v658_v0  ;;  %v39_v3 = vld [vmem:[#allocation2] sm:$0x3]  ;;  %v46_v4 = vand.u32 4294901760, %v41_v1  ;;  %v48_v5 = vand.u32 4294901760, %v40_v2  ;;  %s659_s1 = smov [#allocation7]   ;;  %s660_s9 = smov [#allocation8]  }
  0x28   :  { %v44_v6 = vsel %vm42_vm0, %v39_v3, 0  ;;  %s521_s8 = sshll.u32 %s659_s1, 4  ;;  %s531_s10 = sshll.u32 %s660_s9, 4  ;;  %vm511_vm1 = vcmask 123904   ;;  %vm513_vm2 = vcmask 58368   ;;  %s522_s8 = int_to_ptr.vmem [resolvable:$true] %s521_s8  ;;  %s532_s10 = int_to_ptr.vmem [resolvable:$true] %s531_s10 }
  0x29   :  { %v113_v7 = vand.u32 4294901760, %v44_v6  ;;  %284 = vmatprep.subr.mxu0 %v46_v4  ;;  %v131_v8 = vsub.f32 %v40_v2, %v48_v5  ;;  %47 = vmatprep.subr.mxu1 %v46_v4  ;;  %v125_v9 = vsub.f32 %v41_v1, %v46_v4  ;;  %s604_s11 = scalar_lea.vmem %s522_s8, 32  ;;  %p609_p3 = scmp.lt.s32.totalorder %s522_s8, %s522_s8 }
  0x2a   :  { %286 = vmatpush1.msra.mxu0 %v48_v5  ;;  %49 = vmatpush1.msra.mxu1 %v48_v5  ;;  %p605_p2 = scmp.ne.s32.totalorder %s522_s8, %s604_s11  ;;  %p610_p4 = scmp.lt.s32.totalorder %s604_s11, %s604_s11 }
  0x2b   :  { %v114_v10 = vsub.f32 %v44_v6, %v113_v7  ;;  %v126_v11 = vand.u32 4294901760, %v125_v9  ;;  %v132_v12 = vand.u32 4294901760, %v131_v8 }
  0x2c   :  { %p611_p5 = por %p610_p4, %p609_p3 }
  0x2d   :  { %v115_v13 = vand.u32 4294901760, %v114_v10  ;;  %v127_v14 = vsub.f32 %v125_v9, %v126_v11  ;;  %362 = vmatprep.subr.mxu0 %v126_v11  ;;  %v133_v15 = vsub.f32 %v131_v8, %v132_v12 }
  0x2e   :  { %p612_p6 = pnand %p611_p5, %p605_p2 }
  0x2f   :  { %353 = vmatmul.mubr.f32.vlgmr.msra.gmra.mrb[0].mxu0 %v115_v13  ;;  %v116_v16 = vsub.f32 %v114_v10, %v115_v13  ;;  %v128_v17 = vand.u32 4294901760, %v127_v14  ;;  %v134_v18 = vand.u32 4294901760, %v133_v15 }
  0x30   :  { %366 = vmatpush1.msra.mxu0 %v132_v12  ;;  %429 = vmatprep.mubr.f32.mxu0 %v658_v0 }
  0x31   :  { %v117_v19 = vand.u32 4294901760, %v116_v16  ;;  %438 = vmatprep.subr.mxu0 %v46_v4  ;;  %129 = vmatprep.subr.mxu1 %v128_v17 }
  0x33   :  { %118 = vmatmul.mubr.f32.vlgmr.msra.gmra.mrb[0].mxu1 %v117_v19 }
  0x34   :  { %135 = vmatpush1.msra.mxu1 %v134_v18  ;;  %198 = vmatprep.mubr.f32.mxu1 %v658_v0 }
  0x35   :  { %208 = vmatprep.subr.mxu1 %v125_v9 }
  0x37   :  { %431 = vmatmul.mubr.f32.vlgmr.msra.gmra.mrb[0].mxu0 %v113_v7 }
  0x38   :  { %440 = vmatpush1.msra.mxu0 %v48_v5  ;;  %503 = vmatprep.mubr.f32.mxu0 %v658_v0 }
  0x3b   :  { %200 = vmatmul.mubr.f32.vlgmr.msra.gmra.mrb[0].mxu1 %v113_v7 }
  0x3c   :  { %211 = vmatpush1.msra.mxu1 %v131_v8  ;;  %274 = vmatprep.mubr.f32.mxu1 %v658_v0 }
  0x3f   :  { %505 = vmatmul.mubr.f32.vlgmr.msra.gmra.mrb[0].mxu0 %v113_v7 }
  0x43   :  { %277 = vmatmul.mubr.f32.vlgmr.msra.gmra.mrb[0].mxu1 %v114_v10 }
 0x112   :  { %v506_v20 = vpop.f32.mrb[0].mxu0 }
 0x113   :  { %v508_v21 = vpop.f32.mrb[1].mxu0 }
 0x116   :  { %v278_v22 = vpop.f32.mrb[0].mxu1 }
 0x117   :  { %v545_v23 = vadd.f32 %v506_v20, %v278_v22  ;;  %v280_v24 = vpop.f32.mrb[1].mxu1 }
 0x118   :  { %v546_v25 = vadd.f32 %v508_v21, %v280_v24 }
 0x119   :  { %512 = vst.msk [vmem:[#allocation7] sm:$0x3] %vm511_vm1, %v545_v23 }
 0x11a   :  { %615 = shalt.err (!%p612_p6)
}
 0x11b   :  { %s616_s14 = scalar_lea.hbm %s732_s2, 32 }
 0x11c   :  { %p617_p7 = scmp.ne.s32.totalorder %s732_s2, %s616_s14  ;;  %p620_p8 = scmp.lt.u32.totalorder %s616_s14, %s732_s2 }
 0x11e   :  { %p622_p9 = pnand %p620_p8, %p617_p7 }
 0x120   :  { %625 = shalt.err (!%p622_p9)
}
 0x121   :  { %524 = dma.vmem_to_hbm [thread:$0]  %s522_s8, 32, %s732_s2, [#allocation4]   ;;  %514 = vst.msk [vmem:[#allocation8] sm:$0x3] %vm513_vm2, %v546_v25 }
 0x122   :  { %s626_s21 = scalar_lea.vmem %s532_s10, 32  ;;  %p631_p11 = scmp.lt.s32.totalorder %s532_s10, %s532_s10 }
 0x123   :  { %p627_p10 = scmp.ne.s32.totalorder %s532_s10, %s626_s21  ;;  %p632_p12 = scmp.lt.s32.totalorder %s626_s21, %s626_s21 }
 0x125   :  { %p633_p13 = por %p632_p12, %p631_p11 }
 0x127   :  { %p634_p0 = pnand %p633_p13, %p627_p10 }
 0x129   :  { %637 = shalt.err (!%p634_p0)
}
 0x12a   :  { %s638_s24 = scalar_lea.hbm %s733_s3, 32 }
 0x12b   :  { %p639_p1 = scmp.ne.s32.totalorder %s733_s3, %s638_s24  ;;  %p642_p2 = scmp.lt.u32.totalorder %s638_s24, %s733_s3 }
 0x12d   :  { %p644_p3 = pnand %p642_p2, %p639_p1 }
 0x12f   :  { %647 = shalt.err (!%p644_p3)
}
 0x130   :  { %534 = dma.vmem_to_hbm [thread:$0]  %s532_s10, 32, %s733_s3, [#allocation9]  }
 0x131   :  { %652 = dma.done.wait [#allocation4], 32  }
 0x132   :  { %653 = vsyncadd [#allocation4], 4294967264 }
 0x133   :  { %654 = dma.done.wait [#allocation9], 32  }
 0x134   :  { %655 = vsyncadd [#allocation9], 4294967264 }
 0x135   :  { %541 = vsyncpa [#allocation3], 1 }
 0x136   :  { %542 = vsyncpa [#allocation6], 1 }
 0x137   :  { %543 = vsyncpa [#allocation4], 1 }
 0x138   :  { %544 = vsyncpa [#allocation9], 1 }

</bundles_post_ra>
